<compile_context>
chip_gen: v6e
topology: v6e:2x2x1
jax: 0.10.0
libtpu: 0.0.40
codegen_flags: <defaults>
</compile_context>

<pallas_src>
import functools

import jax
import jax.numpy as jnp
from jax.experimental import pallas as pl
from jax.experimental.pallas import tpu as pltpu


# ----------------------------------------------------------------------------
# Helpers
# ----------------------------------------------------------------------------
def _round_up(v, m):
    return ((v + m - 1) // m) * m


def _sublane_multiple(dtype):
    """Packed-sublane row multiple for a dtype: 8 (f32), 16 (bf16), 32 (i8/fp8)."""
    return max(8, 32 // jnp.dtype(dtype).itemsize)


def _default_vmem_limit():
    """Generation-aware scoped-VMEM limit: ~3/4 of physical, capped at 100 MiB.

    v7x (64 MiB physical) -> 48 MiB; v5e / v6e (128 MiB) -> 96 MiB.
    """
    cap = 64 << 20
    try:
        info = pltpu.get_tpu_info()
        cap = int(getattr(info, "vmem_capacity_bytes", cap)) or cap
    except Exception:
        pass
    return min((cap * 3) // 4, 100 << 20)


def _pad2d(x, rows=None, cols=None):
    r, c = x.shape
    pr = 0 if rows is None else rows - r
    pc = 0 if cols is None else cols - c
    if pr == 0 and pc == 0:
        return x
    return jnp.pad(x, ((0, pr), (0, pc)))


# ----------------------------------------------------------------------------
# Generic tiled matmul kernel with optional fused ReLU.
# ----------------------------------------------------------------------------
def _matmul_kernel(lhs_ref, rhs_ref, o_ref, acc_ref, *, apply_relu, tk,
                   rhs_resident):
    """o = relu?(lhs @ rhs); grid = (M tiles, K tiles); f32 accumulation.

    lhs_ref : (tm, tk)             streamed tile of the left operand
    rhs_ref : (tk, n) or (Kp, n)   streamed tile / fully VMEM-resident RHS
    o_ref   : (tm, n)              written once, on the last K step
    acc_ref : (tm, n) f32          persists across the K (reduction) axis
    """
    k = pl.program_id(1)

    @pl.when(k == 0)
    def _():
        acc_ref[...] = jnp.zeros_like(acc_ref)

    if rhs_resident:
        off = pl.multiple_of(k * tk, 128)
        rhs = rhs_ref[pl.ds(off, tk), :]
    else:
        rhs = rhs_ref[...]

    acc_ref[...] += jnp.dot(lhs_ref[...], rhs,
                            preferred_element_type=jnp.float32)

    @pl.when(k == pl.num_programs(1) - 1)
    def _():
        out = acc_ref[...]
        if apply_relu:
            out = jnp.maximum(out, 0.0)
        o_ref[...] = out.astype(o_ref.dtype)


def pallas_matmul(lhs, rhs, *, apply_relu=False, out_dtype=jnp.float32,
                  tile_m=1024, tile_k=1024, min_m_blocks=2,
                  vmem_limit_bytes=None):
    """Tiled MXU matmul: relu?(lhs @ rhs) with f32 accumulation.

    M / K are zero-padded to tile multiples (exact); the right operand is kept
    fully resident in VMEM when it fits, otherwise streamed in (tk, n) blocks.
    """
    m, k = lhs.shape
    k2, n = rhs.shape
    assert k == k2, (lhs.shape, rhs.shape)

    if vmem_limit_bytes is None:
        vmem_limit_bytes = _default_vmem_limit()
    budget = (vmem_limit_bytes * 4) // 5          # leave pipeline headroom

    lhs_sz = jnp.dtype(lhs.dtype).itemsize
    rhs_sz = jnp.dtype(rhs.dtype).itemsize
    out_sz = jnp.dtype(out_dtype).itemsize
    sublane = _sublane_multiple(lhs.dtype)

    # M tile: <= tile_m, multiple of the packed-sublane row count, and (for
    # graphs big enough) at least `min_m_blocks` blocks so both v7x TensorCores
    # get work on the "parallel" axis.
    tm = min(tile_m, _round_up(m, sublane))
    if m >= 2 * sublane * min_m_blocks:
        tm = min(tm, _round_up(pl.cdiv(m, min_m_blocks), sublane))
    tm = max(tm, sublane)

    # K tile: <= tile_k, multiple of 128 (lane width).
    tk = max(128, min(tile_k, _round_up(k, 128)))

    # Keep the RHS fully resident (fetched once via a constant block index,
    # reused by every M tile) when it fits; otherwise stream (tk, n) blocks.
    rhs_resident = _round_up(k, tk) * n * rhs_sz <= budget // 2

    def footprint(tm_, tk_):
        rhs_f = (_round_up(k, tk_) * n * rhs_sz if rhs_resident
                 else 2 * tk_ * n * rhs_sz)
        return (2 * tm_ * tk_ * lhs_sz        # double-buffered lhs tiles
                + rhs_f
                + tm_ * n * 4                 # f32 accumulator scratch
                + 2 * tm_ * n * out_sz)       # double-buffered output tiles

    while footprint(tm, tk) > budget and (tm > sublane or tk > 128):
        if tm > sublane and (tm > tk or tk <= 128):
            tm = max(sublane, tm // 2)
        else:
            tk = max(128, tk // 2)

    # Zero-pad M / K up to tile multiples; padding is exact.
    mp = _round_up(m, tm)
    kp = _round_up(k, tk)
    lhs_p = _pad2d(lhs, rows=mp, cols=kp)
    rhs_p = _pad2d(rhs, rows=kp)

    grid = (pl.cdiv(mp, tm), pl.cdiv(kp, tk))

    if rhs_resident:
        rhs_spec = pl.BlockSpec((kp, n), lambda i, j: (0, 0))
    else:
        rhs_spec = pl.BlockSpec((tk, n), lambda i, j: (j, 0))

    kernel = functools.partial(_matmul_kernel, apply_relu=apply_relu,
                               tk=tk, rhs_resident=rhs_resident)

    out = pl.pallas_call(
        kernel,
        out_shape=jax.ShapeDtypeStruct((mp, n), out_dtype),
        grid=grid,
        in_specs=[
            pl.BlockSpec((tm, tk), lambda i, j: (i, j)),
            rhs_spec,
        ],
        out_specs=pl.BlockSpec((tm, n), lambda i, j: (i, 0)),
        scratch_shapes=[pltpu.VMEM((tm, n), jnp.float32)],
        compiler_params=pltpu.CompilerParams(
            dimension_semantics=("parallel", "arbitrary"),
            vmem_limit_bytes=vmem_limit_bytes,
        ),
    )(lhs_p, rhs_p)

    return out[:m] if mp != m else out


# ----------------------------------------------------------------------------
# GraphConvolution layer and full GCN forward.
# ----------------------------------------------------------------------------
def gcn_layer(x, w, adj, *, apply_relu, out_dtype=None,
              tile_m=1024, tile_k=1024):
    """One GraphConvolution layer: relu?(adj @ (x @ w)) via two Pallas matmuls."""
    if out_dtype is None:
        out_dtype = x.dtype
    # TODO(synk): dropout on the inputs is identity at inference, so omitted.
    support = pallas_matmul(x, w, apply_relu=False, out_dtype=x.dtype,
                            tile_m=tile_m, tile_k=tile_k)
    return pallas_matmul(adj, support, apply_relu=apply_relu,
                         out_dtype=out_dtype, tile_m=tile_m, tile_k=tile_k)


def xavier_uniform(key, fan_in, fan_out, dtype=jnp.float32):
    """Matches torch.nn.init.xavier_uniform_ for a (fan_in, fan_out) matrix."""
    limit = jnp.sqrt(6.0 / (fan_in + fan_out))
    return jax.random.uniform(key, (fan_in, fan_out), dtype=dtype,
                              minval=-limit, maxval=limit)


def init_gcn_params(key, n_layers, n_features, hidden_dim, n_classes):
    """Deterministic parameter init mirroring GCN.__init__ (bias=False)."""
    params = {}
    keys = jax.random.split(key, max(n_layers, 1))
    if n_layers == 1:
        params["first"] = xavier_uniform(keys[0], n_features, n_classes)
    else:
        params["first"] = xavier_uniform(keys[0], n_features, hidden_dim)
        params["last"] = xavier_uniform(keys[-1], hidden_dim, n_classes)
        params["hidden"] = [
            xavier_uniform(keys[1 + i], hidden_dim, hidden_dim)
            for i in range(n_layers - 2)
        ]
    return params


def prepare_adjacency(adj, dtype=jnp.bfloat16):
    """Cast the (normalized) adjacency ONCE at preprocessing / graph-load time.

    The adjacency is the dominant HBM stream every layer; pre-storing it in the
    compute dtype avoids a full-size f32 read + cast pass inside the forward.
    """
    return adj.astype(dtype)


def gcn_forward(params, inputs, adj, n_layers, *, compute_dtype=jnp.bfloat16,
                lane_pad=128, tile_m=1024, tile_k=1024):
    """Forward pass of GCN (inference). Returns (logits, embeddings).

    Weights are zero-padded so hidden/class lane dims are multiples of 128
    (lane-dense outputs, full MXU columns); the feature contraction dim is
    padded inside pallas_matmul. Accumulation is always f32.
    """
    _round = functools.partial(_round_up, m=lane_pad)
    # Adjacency should arrive pre-cast (prepare_adjacency); cast only if needed.
    adj_c = adj if adj.dtype == jnp.dtype(compute_dtype) else adj.astype(compute_dtype)
    x = inputs.astype(compute_dtype)

    if n_layers == 1:
        w = params["first"]
        n_classes = w.shape[1]
        w_p = _pad2d(w, cols=_round(n_classes)).astype(compute_dtype)
        out = gcn_layer(x, w_p, adj_c, apply_relu=False, out_dtype=jnp.float32,
                        tile_m=tile_m, tile_k=tile_k)[:, :n_classes]
        return out, out

    w1 = params["first"]
    hidden = w1.shape[1]
    h_pad = _round(hidden)

    x = gcn_layer(x, _pad2d(w1, cols=h_pad).astype(compute_dtype), adj_c,
                  apply_relu=True, out_dtype=compute_dtype,
                  tile_m=tile_m, tile_k=tile_k)
    for w in params.get("hidden", []):
        x = gcn_layer(x, _pad2d(w, rows=h_pad, cols=h_pad).astype(compute_dtype),
                      adj_c, apply_relu=True, out_dtype=compute_dtype,
                      tile_m=tile_m, tile_k=tile_k)
    embeddings = x[:, :hidden].astype(jnp.float32)

    w_last = params["last"]
    n_classes = w_last.shape[1]
    c_pad = _round(n_classes)
    out = gcn_layer(x, _pad2d(w_last, rows=h_pad, cols=c_pad).astype(compute_dtype),
                    adj_c, apply_relu=False, out_dtype=jnp.float32,
                    tile_m=tile_m, tile_k=tile_k)[:, :n_classes]
    return out, embeddings


def gcn_forward_ref(params, inputs, adj, n_layers):
    """Pure-JAX reference (f32, highest precision) for correctness checking."""
    hi = jax.lax.Precision.HIGHEST

    def layer(x, w, relu):
        out = jnp.dot(adj, jnp.dot(x, w, precision=hi), precision=hi)
        return jnp.maximum(out, 0.0) if relu else out

    if n_layers == 1:
        x = layer(inputs, params["first"], False)
        return x, x
    x = layer(inputs, params["first"], True)
    for w in params.get("hidden", []):
        x = layer(x, w, True)
    emb = x
    x = layer(x, params["last"], False)
    return x, emb


if __name__ == "__main__":
    # Small deterministic problem: 256 nodes, 32 features, 64 hidden, 8 classes.
    N_NODES, N_FEATURES, HIDDEN, N_CLASSES, N_LAYERS = 256, 32, 64, 8, 3

    root = jax.random.PRNGKey(0)
    k_x, k_adj, k_params = jax.random.split(root, 3)

    x = jax.random.normal(k_x, (N_NODES, N_FEATURES), dtype=jnp.float32)

    # Symmetric, row-normalized synthetic adjacency (with self loops).
    a = (jax.random.uniform(k_adj, (N_NODES, N_NODES)) < 0.1).astype(jnp.float32)
    a = jnp.maximum(a, a.T) + jnp.eye(N_NODES, dtype=jnp.float32)
    adj = a / jnp.sum(a, axis=1, keepdims=True)

    params = init_gcn_params(k_params, N_LAYERS, N_FEATURES, HIDDEN, N_CLASSES)

    hi = jax.lax.Precision.HIGHEST

    # --- (a) non-divisible shapes: zero-pad + cdiv grid, resident-RHS path ---
    ta = jax.random.normal(jax.random.PRNGKey(1), (300, 200), jnp.float32)
    tb = jax.random.normal(jax.random.PRNGKey(2), (200, 128), jnp.float32)
    tout = jax.block_until_ready(pallas_matmul(ta, tb, tile_m=128, tile_k=128))
    assert tout.shape == (300, 128)
    assert jnp.allclose(tout, jnp.dot(ta, tb, precision=hi),
                        atol=1e-2, rtol=1e-3), "resident-path matmul mismatch"

    # --- (b) tight VMEM budget: streaming (tk, n) RHS with K-accumulation ----
    tc = jax.random.normal(jax.random.PRNGKey(3), (256, 1024), jnp.float32)
    td = jax.random.normal(jax.random.PRNGKey(4), (1024, 512), jnp.float32)
    tout2 = jax.block_until_ready(pallas_matmul(tc, td, vmem_limit_bytes=4 << 20))
    assert jnp.allclose(tout2, jnp.dot(tc, td, precision=hi),
                        atol=5e-2, rtol=1e-3), "streaming-path matmul mismatch"

    # --- f32 GCN forward (strict check against the reference) ----------------
    out, emb = gcn_forward(params, x, adj, N_LAYERS, compute_dtype=jnp.float32)
    out = jax.block_until_ready(out)
    emb = jax.block_until_ready(emb)

    out_ref, emb_ref = gcn_forward_ref(params, x, adj, N_LAYERS)
    assert out.shape == (N_NODES, N_CLASSES)
    assert emb.shape == (N_NODES, HIDDEN)
    assert jnp.allclose(out, out_ref, atol=1e-4, rtol=1e-4)
    assert jnp.allclose(emb, emb_ref, atol=1e-4, rtol=1e-4)

    # --- bf16 performance path: adjacency pre-cast ONCE, f32 accumulation ----
    adj_bf16 = prepare_adjacency(adj, jnp.bfloat16)
    out_bf, _ = gcn_forward(params, x, adj_bf16, N_LAYERS)   # default bf16
    out_bf = jax.block_until_ready(out_bf)
    assert jnp.allclose(out_bf, out_ref, atol=1e-2, rtol=1e-1)

    print("KERNEL_OK")
</pallas_src>

<mosaic_0001>
module attributes {stable_mosaic.version = 11 : i64} {
  func.func @_matmul_kernel(%arg0: i32, %arg1: i32, %arg2: memref<128x128xf32, #tpu.memory_space<vmem>>, %arg3: memref<256x128xf32, #tpu.memory_space<vmem>>, %arg4: memref<128x128xf32, #tpu.memory_space<vmem>>, %arg5: memref<128x128xf32, #tpu.memory_space<vmem>>) attributes {dimension_semantics = [#tpu.dimension_semantics<parallel>, #tpu.dimension_semantics<arbitrary>], iteration_bounds = array<i64: 3, 2>, scalar_prefetch = 0 : i64, scratch_operands = 1 : i64, tpu.core_type = #tpu.core_type<tc>, window_params = [{transform_indices = @transform_0, window_bounds = array<i64: 128, 128>}, {pipeline_mode = #tpu.pipeline_mode<synchronous>, transform_indices = @transform_1, window_bounds = array<i64: 256, 128>}, {transform_indices = @transform_2, window_bounds = array<i64: 128, 128>}]} {
    %c0_i32 = arith.constant 0 : i32
    %0 = arith.cmpi eq, %arg1, %c0_i32 : i32
    %1 = arith.extui %0 : i1 to i32
    %c0_i32_0 = arith.constant 0 : i32
    %2 = arith.cmpi ne, %1, %c0_i32_0 : i32
    scf.if %2 {
      %cst_8 = arith.constant 0.000000e+00 : f32
      %15 = vector.broadcast %cst_8 : f32 to vector<128x128xf32>
      %c0_9 = arith.constant 0 : index
      %c0_10 = arith.constant 0 : index
      %16 = vector.load %arg5[%c0_9, %c0_10] : memref<128x128xf32, #tpu.memory_space<vmem>>, vector<128x128xf32>
      tpu.vector_store %arg5[%c0_9, %c0_10], %15 {strides = array<i32>} : memref<128x128xf32, #tpu.memory_space<vmem>>, vector<128x128xf32>,
    } else {
    }
    %c128_i32 = arith.constant 128 : i32
    %3 = arith.muli %arg1, %c128_i32 : i32
    %4 = tpu.assume_multiple %3, 128 : i32
    %5 = arith.index_cast %4 : i32 to index
    %c0 = arith.constant 0 : index
    %6 = vector.load %arg3[%5, %c0] : memref<256x128xf32, #tpu.memory_space<vmem>>, vector<128x128xf32>
    %c0_1 = arith.constant 0 : index
    %c0_2 = arith.constant 0 : index
    %7 = vector.load %arg5[%c0_1, %c0_2] : memref<128x128xf32, #tpu.memory_space<vmem>>, vector<128x128xf32>
    %c0_3 = arith.constant 0 : index
    %c0_4 = arith.constant 0 : index
    %8 = vector.load %arg2[%c0_3, %c0_4] : memref<128x128xf32, #tpu.memory_space<vmem>>, vector<128x128xf32>
    %cst = arith.constant dense<0.000000e+00> : vector<128x128xf32>
    %9 = tpu.matmul %8, %6, %cst {dimension_numbers = #tpu.dot_dimension_numbers<[1], [0], [0], [1], [0, 0, 1, 1], [], []>} : vector<128x128xf32>, vector<128x128xf32>, vector<128x128xf32> -> vector<128x128xf32>
    %10 = arith.addf %7, %9 : vector<128x128xf32>
    %c0_5 = arith.constant 0 : index
    %c0_6 = arith.constant 0 : index
    %11 = vector.load %arg5[%c0_5, %c0_6] : memref<128x128xf32, #tpu.memory_space<vmem>>, vector<128x128xf32>
    tpu.vector_store %arg5[%c0_5, %c0_6], %10 {strides = array<i32>} : memref<128x128xf32, #tpu.memory_space<vmem>>, vector<128x128xf32>,
    %c1_i32 = arith.constant 1 : i32
    %12 = arith.cmpi eq, %arg1, %c1_i32 : i32
    %13 = arith.extui %12 : i1 to i32
    %c0_i32_7 = arith.constant 0 : i32
    %14 = arith.cmpi ne, %13, %c0_i32_7 : i32
    scf.if %14 {
      %c0_8 = arith.constant 0 : index
      %c0_9 = arith.constant 0 : index
      %15 = vector.load %arg5[%c0_8, %c0_9] : memref<128x128xf32, #tpu.memory_space<vmem>>, vector<128x128xf32>
      %c0_10 = arith.constant 0 : index
      %c0_11 = arith.constant 0 : index
      %16 = vector.load %arg4[%c0_10, %c0_11] : memref<128x128xf32, #tpu.memory_space<vmem>>, vector<128x128xf32>
      tpu.vector_store %arg4[%c0_10, %c0_11], %15 {strides = array<i32>} : memref<128x128xf32, #tpu.memory_space<vmem>>, vector<128x128xf32>,
    } else {
    }
    return
  }
  func.func @transform_0(%arg0: i32, %arg1: i32) -> (i32, i32) {
    %c0_i32 = arith.constant 0 : i32
    return %arg0, %arg1 : i32, i32
  }
  func.func @transform_1(%arg0: i32, %arg1: i32) -> (i32, i32) {
    %c0_i32 = arith.constant 0 : i32
    %c0_i32_0 = arith.constant 0 : i32
    %c0_i32_1 = arith.constant 0 : i32
    return %c0_i32, %c0_i32_0 : i32, i32
  }
  func.func @transform_2(%arg0: i32, %arg1: i32) -> (i32, i32) {
    %c0_i32 = arith.constant 0 : i32
    %c0_i32_0 = arith.constant 0 : i32
    return %arg0, %c0_i32 : i32, i32
  }
}

</mosaic_0001>

<bundles_post_ra>
// kernel: tpu_custom_call.1
= control target key start
LH: loop header
LB: loop body
LE: loop exit
PB: predicated region body
PF: predicated region fallthrough
CT: control target
= control target key end

     0   :  { %s1349_s0 = inlined_call_operand.hbm [shape: f32[384,256], index: 0, kind: input, shape index: {}]   ;;  %s1350_s1 = inlined_call_operand.hbm [shape: f32[256,128], index: 1, kind: input, shape index: {}]   ;;  %s1351_s2 = inlined_call_operand.hbm [shape: f32[384,128], index: 2, kind: output, shape index: {}]  }
   0x1   :  { %1364 = sst [smem:[#allocation17_spill]] %s1350_s1 }
   0x2   :  { %1365 = sst [smem:[#allocation18_spill]] %s1351_s2 }
   0x3   :  { %7 = vsyncpa [#allocation4], 0 }
   0x4   :  { %9 = vsyncpa [#allocation4 + $0x1], 0 }
   0x5   :  { %10 = vsyncpa [#allocation7], 0 }
   0x6   :  { %11 = vsyncpa [#allocation5], 0 }
   0x7   :  { %13 = vsyncpa [#allocation5 + $0x1], 0  ;;  %s1056_s9 = smov 0   ;;  %s1058_s10 = smov 0  }
   0x8   :  { %s1060_s11 = smov 0   ;;  %s1062_s12 = smov 0  }
   0x9   :  { %s1064_s13 = smov 0   ;;  %s1066_s14 = smov 0  }
   0xa   :  { %s1068_s15 = smov 0   ;;  %s1070_s16 = smov 0  }
   0xb   :  { %s1072_s17 = smov 0   ;;  %s1074_s18 = smov 0  }
   0xc   :  { %s1076_s19 = smov 0  }
   0xd LB: > { %1366 = sst [smem:[#allocation12_spill]] %s990_s9  ;;  %s590_s20 = sadd.s32 4294967295, %s1030_s19   ;;  %s1030_s19 = sphi %s1076_s19, %s1404_s19   ;;  %s1026_s18 = sphi %s1074_s18, %s1403_s18   ;;  %s1022_s17 = sphi %s1072_s17, %s1402_s17   ;;  %s1018_s16 = sphi %s1070_s16, %s1401_s16   ;;  %s1014_s15 = sphi %s1068_s15, %s1400_s15   ;;  %s1010_s14 = sphi %s1066_s14, %s1399_s14   ;;  %s1006_s13 = sphi %s1064_s13, %s1398_s13   ;;  %s1002_s12 = sphi %s1062_s12, %s1397_s12   ;;  %s998_s11 = sphi %s1060_s11, %s1396_s11   ;;  %s994_s10 = sphi %s1058_s10, %s1395_s10   ;;  %s990_s9 = sphi %s1056_s9, %s1394_s9  }
   0xe   : > { %1367 = sst [smem:[#allocation13_spill]] %s1030_s19  ;;  %s591_s21 = sadd.s32 4294967294, %s1030_s19  }
   0xf   : > { %p47_p0 = scmp.ne.s32.totalorder %s1010_s14, %s1006_s13  ;;  %p48_p1 = scmp.eq.s32.totalorder %s1030_s19, 0 }
  0x10   : > { %p53_p2 = scmp.ne.s32.totalorder %s1006_s13, %s1002_s12  ;;  %p1116_p3 = scmp.eq.s32.totalorder %s590_s20, 0 }
  0x11   : > { %p1121_p4 = por %p48_p1, %p47_p0  ;;  %p97_p5 = scmp.ne.s32.totalorder %s998_s11, %s994_s10 }
  0x12   : > { %p1129_p6 = por %p1116_p3, %p53_p2  ;;  %p98_p7 = scmp.eq.s32.totalorder %s590_s20, 5 }
  0x13   : > { %p103_p8 = scmp.ne.s32.totalorder %s994_s10, %s990_s9  ;;  %p104_p9 = scmp.eq.s32.totalorder %s591_s21, 5 }
  0x14   : > { %s1370_s26 = scalar_select %p1129_p6, 1, 0 }
  0x15   : > { %p1135_p10 = por %p98_p7, %p97_p5  ;;  %p592_p11 = scmp.ge.s32.totalorder %s1030_s19, 1 }
  0x16   : > { %p1140_p12 = por %p104_p9, %p103_p8  ;;  %p111_p13 = scmp.lt.s32.totalorder %s1030_s19, 7 }
  0x17   : > { %s1371_s27 = scalar_select %p1135_p10, 1, 0 }
  0x18   : > { %s1372_s28 = scalar_select %p1140_p12, 1, 0 }
  0x19   : > { %p1145_p0 = pnand %p592_p11, %p111_p13  ;;  %s1032_s30 = smov [#allocation6]  }
  0x1a   : > { %1373 = sst [smem:[#allocation14_spill]] %s1372_s28  ;;  %s123_s3 = sshll.u32 %s1032_s30, 4  ;;  %s124_s3 = int_to_ptr.vmem [resolvable:$true] %s123_s3 }
  0x1b   : > { %s1374_s29 = scalar_select %p1145_p0, 1, 0 }
  0x1c   : > { %p741_p1 = pneg %p1145_p0  ;;  %p754_p2 = scmp.lt.s32.totalorder %s1030_s19, 6 }
  0x1d   : > { %s863_s6 = scalar_lea.vmem %s124_s3, 4096  ;;  %p871_p12 = scmp.lt.s32.totalorder %s124_s3, %s124_s3 }
  0x1e   : > { %p1154_p5 = pnand %p741_p1, %p1116_p3  ;;  %p1160_p7 = pnand %p754_p2, %p1121_p4 }
  0x1f   : > { %p864_p9 = scmp.ne.s32.totalorder %s124_s3, %s863_s6  ;;  %p872_p10 = scmp.lt.s32.totalorder %s863_s6, %s863_s6 }
  0x20   : > { %p854_p8 = pneg %p1154_p5 }
  0x21   : > { %p873_p6 = por %p872_p10, %p871_p12 }
  0x22   : > { %p866_p11 = pnand %p864_p9, %p854_p8 }
  0x24   : > { %p867_p13 = pneg %p866_p11 }
  0x26   : > { %p874_p0 = pnand %p873_p6, %p867_p13 }
  0x28   : > { %877 = shalt.err (!%p874_p0)
}
  0x29   : > { %s1355_s7 = smov 128   ;;  %s1356_s8 = smov 8  }
  0x2a   : > { %s1377_s1 = sld [smem:[#allocation17_spill]]  ;;  %s28_s21 = sadd.s32 1, %s1022_s17 }
  0x2b   : > { %s31_s25 = sadd.s32 1, %s1026_s18  ;;  %p29_p4 = scmp.ge.s32.totalorder %s28_s21, 2 }
  0x2c   : > { %s137_s30 = sand.u32 1, %s1010_s14   ;;  %s611_s22 = sshll.u32 %s1026_s18, 5 }
  0x2d   : > { %s595_s6 = sshll.u32 %s137_s30, 7  ;;  %s1406_s21 = smov (%p29_p4, %s28_s21), 0 }
  0x2e   : > { %1378 = sst [smem:[#allocation15_spill]] %s1406_s21  ;;  %s1408_s25 = smov (!%p29_p4, %s31_s25), %s1026_s18 }
  0x2f   : > { %s36_s4 = ssub.s32 %s1022_s17, %s1406_s21  ;;  %p33_p6 = scmp.ge.s32.totalorder %s1408_s25, 3 }
  0x30   : > { %744 = dma.hbm_to_vmem [thread:$0]  (!%p1154_p5), %s1377_s1, 4096, %s124_s3, [#allocation7], %s1355_s7, %s1355_s7, %s1356_s8  }
  0x31   : > { %s147_s12 = sadd.s32 %s1022_s17, %s611_s22  ;;  %s141_s3 = scalar_lea.vmem [#allocation3], %s595_s6 }
  0x32   : > { %s150_s20 = sshll.u32 %s141_s3, 4  ;;  %s1410_s25 = smov (%p33_p6, %s1408_s25), 0  ;;  %s151_s20 = int_to_ptr.vmem [resolvable:$true] %s150_s20 }
  0x33   : > { %1379 = sst [smem:[#allocation16_spill]] %s1410_s25  ;;  %s598_s7 = sshll.u32 %s147_s12, 7 }
  0x34   : > { %s35_s8 = ssub.s32 %s1026_s18, %s1410_s25  ;;  %s149_s28 = scalar_lea.hbm %s1349_s0, %s598_s7 }
  0x35   : > { %s37_s9 = sor.u32 %s36_s4, %s35_s8  ;;  %p85_p10 = scmp.eq.s32.totalorder %s35_s8, 0 }
  0x36   : > { %p38_p12 = scmp.eq.s32.totalorder %s37_s9, 0  ;;  %s1380_s21 = sadd.s32 1, %s998_s11 }
  0x37   : > { %s1194_s19 = scalar_select %p85_p10, %s998_s11, %s1380_s21  }
  0x38   : > { %s1381_s2 = sadd.s32 1, %s1010_s14  ;;  %s138_s6 = scalar_lea.sflag [#allocation4], %s137_s30 }
  0x39   : > { %s1199_s22 = scalar_select %p38_p12, %s1010_s14, %s1381_s2  }
  0x3a   : > { %p880_p0 = pneg %p1160_p7  ;;  %s891_s3 = scalar_lea.vmem %s151_s20, 2048 }
  0x3b   : > { %p892_p1 = scmp.ne.s32.totalorder %s151_s20, %s891_s3  ;;  %s1035_s12 = smov [#allocation3]  }
  0x3c   : > { %s896_s25 = sshll.u32 %s1035_s12, 4  ;;  %s897_s25 = int_to_ptr.vmem [resolvable:$false] %s896_s25 }
  0x3d   : > { %p894_p2 = pnand %p892_p1, %p880_p0  ;;  %s898_s1 = scalar_lea.vmem %s897_s25, 4096 }
  0x3e   : > { %p899_p8 = scmp.lt.s32.totalorder %s151_s20, %s897_s25  ;;  %p900_p9 = scmp.lt.s32.totalorder %s898_s1, %s891_s3 }
  0x3f   : > { %p895_p5 = pneg %p894_p2 }
  0x40   : > { %p901_p11 = por %p900_p9, %p899_p8 }
  0x42   : > { %p902_p13 = pnand %p901_p11, %p895_p5 }
  0x44   : > { %905 = shalt.err (!%p902_p13)
}
  0x45   : > { %s1036_s9 = smov 256   ;;  %s1382_s2 = smov 8  }
  0x46   : > { %s1383_s24 = smov 128   ;;  %p1384_p4 = scmp.ne.s32.totalorder %s1374_s29, 0 }
  0x47   : > { %748 = dma.hbm_to_vmem [thread:$0]  (!%p1160_p7), %s149_s28, 2048, %s151_s20, %s138_s6, %s1036_s9, %s1383_s24, %s1382_s2  }
  0x48   : > { %162 = sbr.rel (%p1384_p4) target bundleno = 376 (0x178), region = 28  ;;  %s164_s7 = sand.u32 (!%p1384_p4), 1, %s1006_s13  }
  0x49   : > { %s600_s8 = sshll.u32 (!%p1384_p4), %s164_s7, 7  ;;  %s165_s21 = scalar_lea.sflag (!%p1384_p4), [#allocation4], %s164_s7 }
  0x4a   : > { %s1210_s30 = scalar_lea.vmem (!%p1384_p4), [#allocation3], %s600_s8  ;;  %p1385_p6 = scmp.ne.s32.totalorder (!%p1384_p4), %s1370_s26, 0 }
  0x4d   : > { %977 = dma.done.wait (%p1385_p6), %s165_s21, 2048  }
  0x4e   : > { %979 = vsyncadd (%p1385_p6), %s165_s21, 4294965248 }
  0x4f   : > { %981 = dma.done.wait (%p1116_p3), [#allocation7], 4096  }
  0x50   : > { %983 = vsyncadd (%p1116_p3), [#allocation7], 4294963200  ;;  %s190_s28 = sand.u32 1, %s994_s10   ;;  %p603_p7 = scmp.ne.s32.totalorder %s1014_s15, 0 }
  0x51   : > { %s602_s29 = sshll.u32 %s190_s28, 7 }
  0x52   : > { %s1223_s5 = scalar_lea.vmem [#allocation8], %s602_s29  ;;  %198 = sbr.rel (%p603_p7) target bundleno = 96 (0x60), region = 40 }
  0x57   : > { %v1037_v0 = vmov 0.0  }
  0x58   : > { %199 = vst [vmem:[#allocation2 + $0x30] sm:$0xff] %v1037_v0  ;;  %200 = vst [vmem:[#allocation2] sm:$0xff] %v1037_v0 }
  0x59   : > { %201 = vst [vmem:[#allocation2 + $0x58] sm:$0xff] %v1037_v0  ;;  %202 = vst [vmem:[#allocation2 + $0x18] sm:$0xff] %v1037_v0 }
  0x5a   : > { %203 = vst [vmem:[#allocation2 + $0x50] sm:$0xff] %v1037_v0  ;;  %204 = vst [vmem:[#allocation2 + $0x68] sm:$0xff] %v1037_v0 }
  0x5b   : > { %205 = vst [vmem:[#allocation2 + $0x8] sm:$0xff] %v1037_v0  ;;  %206 = vst [vmem:[#allocation2 + $0x48] sm:$0xff] %v1037_v0 }
  0x5c   : > { %207 = vst [vmem:[#allocation2 + $0x40] sm:$0xff] %v1037_v0  ;;  %208 = vst [vmem:[#allocation2 + $0x20] sm:$0xff] %v1037_v0 }
  0x5d   : > { %209 = vst [vmem:[#allocation2 + $0x10] sm:$0xff] %v1037_v0  ;;  %210 = vst [vmem:[#allocation2 + $0x38] sm:$0xff] %v1037_v0 }
  0x5e   : > { %211 = vst [vmem:[#allocation2 + $0x60] sm:$0xff] %v1037_v0  ;;  %212 = vst [vmem:[#allocation2 + $0x70] sm:$0xff] %v1037_v0 }
  0x5f   : > { %213 = vst [vmem:[#allocation2 + $0x78] sm:$0xff] %v1037_v0  ;;  %214 = vst [vmem:[#allocation2 + $0x28] sm:$0xff] %v1037_v0 }
  0x60 PF: > { %s604_s23 = sshll.u32 %s1014_s15, 7  ;;  %v249_v1 = vld [vmem:[%s1210_s30] sm:$0xff]  ;;  %v250_v19 = vld [vmem:[%s1210_s30 + $0x8] sm:$0xff]  ;;  %v251_v21 = vld [vmem:[%s1210_s30 + $0x10] sm:$0xff]  ;;  %p605_p3 = scmp.ne.s32.totalorder %s1014_s15, 1 }
  0x61   : > { %v257_v2 = vld [vmem:[%s1210_s30 + $0x40] sm:$0xff]  ;;  %677 = vmatprep.mubr.f32.mxu0 %v249_v1  ;;  %s1229_s26 = scalar_lea.vmem [#allocation6], %s604_s23  ;;  %v258_v20 = vld [vmem:[%s1210_s30 + $0x48] sm:$0xff]  ;;  %v259_v22 = vld [vmem:[%s1210_s30 + $0x50] sm:$0xff] }
  0x62   : > { %689 = vmatprep.mubr.f32.mxu1 %v257_v2  ;;  %v232_v3 = vld [vmem:[%s1229_s26 + $0x78] sm:$0xff]  ;;  %v231_v4 = vld [vmem:[%s1229_s26 + $0x70] sm:$0xff]  ;;  %v230_v5 = vld [vmem:[%s1229_s26 + $0x68] sm:$0xff] }
  0x63   : > { %645 = vmatprep.subr.mxu0 %v232_v3  ;;  %701 = vmatprep.subr.mxu1 %v232_v3  ;;  %v229_v6 = vld [vmem:[%s1229_s26 + $0x60] sm:$0xff]  ;;  %v228_v7 = vld [vmem:[%s1229_s26 + $0x58] sm:$0xff]  ;;  %v227_v8 = vld [vmem:[%s1229_s26 + $0x50] sm:$0xff] }
  0x64   : > { %646 = vmatpush3.msra.mxu0 %v232_v3  ;;  %717 = vmatpush3.msra.mxu1 %v232_v3  ;;  %v226_v9 = vld [vmem:[%s1229_s26 + $0x48] sm:$0xff]  ;;  %v225_v10 = vld [vmem:[%s1229_s26 + $0x40] sm:$0xff]  ;;  %v224_v11 = vld [vmem:[%s1229_s26 + $0x38] sm:$0xff] }
  0x65   : > { %647 = vmatprep.subr.mxu0 %v231_v4  ;;  %702 = vmatprep.subr.mxu1 %v231_v4  ;;  %v223_v12 = vld [vmem:[%s1229_s26 + $0x30] sm:$0xff]  ;;  %v222_v13 = vld [vmem:[%s1229_s26 + $0x28] sm:$0xff]  ;;  %v221_v14 = vld [vmem:[%s1229_s26 + $0x20] sm:$0xff] }
  0x66   : > { %648 = vmatpush3.msra.mxu0 %v231_v4  ;;  %718 = vmatpush3.msra.mxu1 %v231_v4  ;;  %v220_v15 = vld [vmem:[%s1229_s26 + $0x18] sm:$0xff]  ;;  %v219_v16 = vld [vmem:[%s1229_s26 + $0x10] sm:$0xff]  ;;  %v218_v17 = vld [vmem:[%s1229_s26 + $0x8] sm:$0xff] }
  0x67   : > { %649 = vmatprep.subr.mxu0 %v230_v5  ;;  %703 = vmatprep.subr.mxu1 %v230_v5  ;;  %v217_v18 = vld [vmem:[%s1229_s26] sm:$0xff]  ;;  %v252_v23 = vld [vmem:[%s1210_s30 + $0x18] sm:$0xff]  ;;  %v254_v27 = vld [vmem:[%s1210_s30 + $0x28] sm:$0xff] }
  0x68   : > { %650 = vmatpush3.msra.mxu0 %v230_v5  ;;  %719 = vmatpush3.msra.mxu1 %v230_v5  ;;  %v260_v24 = vld [vmem:[%s1210_s30 + $0x58] sm:$0xff]  ;;  %v253_v25 = vld [vmem:[%s1210_s30 + $0x20] sm:$0xff]  ;;  %v262_v28 = vld [vmem:[%s1210_s30 + $0x68] sm:$0xff] }
  0x69   : > { %651 = vmatprep.subr.mxu0 %v229_v6  ;;  %704 = vmatprep.subr.mxu1 %v229_v6  ;;  %v261_v26 = vld [vmem:[%s1210_s30 + $0x60] sm:$0xff]  ;;  %v255_v29 = vld [vmem:[%s1210_s30 + $0x30] sm:$0xff]  ;;  %v256_v31 = vld [vmem:[%s1210_s30 + $0x38] sm:$0xff] }
  0x6a   : > { %652 = vmatpush3.msra.mxu0 %v229_v6  ;;  %720 = vmatpush3.msra.mxu1 %v229_v6  ;;  %v263_v30 = vld [vmem:[%s1210_s30 + $0x70] sm:$0xff]  ;;  %v264_v32 = vld [vmem:[%s1210_s30 + $0x78] sm:$0xff]  ;;  %v234_v33 = vld [vmem:[#allocation2] sm:$0xff] }
  0x6b   : > { %653 = vmatprep.subr.mxu0 %v228_v7  ;;  %705 = vmatprep.subr.mxu1 %v228_v7  ;;  %v242_v34 = vld [vmem:[#allocation2 + $0x20] sm:$0xff]  ;;  %v233_v37 = vld [vmem:[#allocation2 + $0x30] sm:$0xff]  ;;  %v236_v43 = vld [vmem:[#allocation2 + $0x18] sm:$0xff] }
  0x6c   : > { %654 = vmatpush3.msra.mxu0 %v228_v7  ;;  %721 = vmatpush3.msra.mxu1 %v228_v7  ;;  %v241_v38 = vld [vmem:[#allocation2 + $0x40] sm:$0xff]  ;;  %v244_v44 = vld [vmem:[#allocation2 + $0x38] sm:$0xff]  ;;  %v243_v50 = vld [vmem:[#allocation2 + $0x10] sm:$0xff] }
  0x6d   : > { %655 = vmatprep.subr.mxu0 %v227_v8  ;;  %706 = vmatprep.subr.mxu1 %v227_v8  ;;  %v235_v49 = vld [vmem:[#allocation2 + $0x58] sm:$0xff]  ;;  %v238_v55 = vld [vmem:[#allocation2 + $0x68] sm:$0xff]  ;;  %v246_v56 = vld [vmem:[#allocation2 + $0x70] sm:$0xff] }
  0x6e   : > { %656 = vmatpush3.msra.mxu0 %v227_v8  ;;  %722 = vmatpush3.msra.mxu1 %v227_v8  ;;  %v237_v61 = vld [vmem:[#allocation2 + $0x50] sm:$0xff]  ;;  %v245_v62 = vld [vmem:[#allocation2 + $0x60] sm:$0xff]  ;;  %v240_v3 = vld [vmem:[#allocation2 + $0x48] sm:$0xff] }
  0x6f   : > { %657 = vmatprep.subr.mxu0 %v226_v9  ;;  %707 = vmatprep.subr.mxu1 %v226_v9  ;;  %v248_v4 = vld [vmem:[#allocation2 + $0x28] sm:$0xff] }
  0x70   : > { %658 = vmatpush3.msra.mxu0 %v226_v9  ;;  %723 = vmatpush3.msra.mxu1 %v226_v9  ;;  %v239_v9 = vld [vmem:[#allocation2 + $0x8] sm:$0xff] }
  0x71   : > { %659 = vmatprep.subr.mxu0 %v225_v10  ;;  %708 = vmatprep.subr.mxu1 %v225_v10 }
  0x72   : > { %660 = vmatpush3.msra.mxu0 %v225_v10  ;;  %724 = vmatpush3.msra.mxu1 %v225_v10  ;;  %v247_v10 = vld [vmem:[#allocation2 + $0x78] sm:$0xff] }
  0x73   : > { %661 = vmatprep.subr.mxu0 %v224_v11  ;;  %709 = vmatprep.subr.mxu1 %v224_v11 }
  0x74   : > { %662 = vmatpush3.msra.mxu0 %v224_v11  ;;  %725 = vmatpush3.msra.mxu1 %v224_v11 }
  0x75   : > { %663 = vmatprep.subr.mxu0 %v223_v12  ;;  %710 = vmatprep.subr.mxu1 %v223_v12 }
  0x76   : > { %664 = vmatpush3.msra.mxu0 %v223_v12  ;;  %726 = vmatpush3.msra.mxu1 %v223_v12 }
  0x77   : > { %665 = vmatprep.subr.mxu0 %v222_v13  ;;  %711 = vmatprep.subr.mxu1 %v222_v13 }
  0x78   : > { %666 = vmatpush3.msra.mxu0 %v222_v13  ;;  %727 = vmatpush3.msra.mxu1 %v222_v13 }
  0x79   : > { %667 = vmatprep.subr.mxu0 %v221_v14  ;;  %712 = vmatprep.subr.mxu1 %v221_v14 }
  0x7a   : > { %668 = vmatpush3.msra.mxu0 %v221_v14  ;;  %728 = vmatpush3.msra.mxu1 %v221_v14 }
  0x7b   : > { %669 = vmatprep.subr.mxu0 %v220_v15  ;;  %713 = vmatprep.subr.mxu1 %v220_v15 }
  0x7c   : > { %670 = vmatpush3.msra.mxu0 %v220_v15  ;;  %729 = vmatpush3.msra.mxu1 %v220_v15 }
  0x7d   : > { %671 = vmatprep.subr.mxu0 %v219_v16  ;;  %714 = vmatprep.subr.mxu1 %v219_v16 }
  0x7e   : > { %672 = vmatpush3.msra.mxu0 %v219_v16  ;;  %730 = vmatpush3.msra.mxu1 %v219_v16 }
  0x7f   : > { %673 = vmatprep.subr.mxu0 %v218_v17  ;;  %715 = vmatprep.subr.mxu1 %v218_v17 }
  0x80   : > { %674 = vmatpush3.msra.mxu0 %v218_v17  ;;  %731 = vmatpush3.msra.mxu1 %v218_v17 }
  0x81   : > { %675 = vmatprep.subr.mxu0 %v217_v18  ;;  %716 = vmatprep.subr.mxu1 %v217_v18 }
  0x82   : > { %676 = vmatpush3.msra.mxu0 %v217_v18  ;;  %732 = vmatpush3.msra.mxu1 %v217_v18 }
  0x83   : > { %678 = vmatmul.mubr.f32.vlgmr.msra.gmra.mxu0 %v250_v19  ;;  %690 = vmatmul.mubr.f32.vlgmr.msra.gmra.mxu1 %v258_v20 }
  0x84   : > { %680 = vmatprep.mubr.f32.mxu0 %v251_v21  ;;  %692 = vmatprep.mubr.f32.mxu1 %v259_v22 }
  0x87   : > { %681 = vmatmul.mubr.f32.gmra.mxu0 %v252_v23  ;;  %693 = vmatmul.mubr.f32.gmra.mxu1 %v260_v24 }
  0x88   : > { %683 = vmatprep.mubr.f32.mxu0 %v253_v25  ;;  %695 = vmatprep.mubr.f32.mxu1 %v261_v26 }
  0x8b   : > { %684 = vmatmul.mubr.f32.gmra.mxu0 %v254_v27  ;;  %696 = vmatmul.mubr.f32.gmra.mxu1 %v262_v28 }
  0x8c   : > { %686 = vmatprep.mubr.f32.mxu0 %v255_v29  ;;  %698 = vmatprep.mubr.f32.mxu1 %v263_v30 }
  0x8f   : > { %687 = vmatmul.mubr.f32.gmra.mxu0 %v256_v31  ;;  %699 = vmatmul.mubr.f32.gmra.mxu1 %v264_v32 }
 0x143   : > { %v679_v35 = vpop.f32.mrf.mxu0  ;;  %v691_v36 = vpop.f32.mrf.mxu1 }
 0x144   : > { %v411_v39 = vadd.f32 %v679_v35, %v234_v33  ;;  %v419_v40 = vadd.f32 %v691_v36, %v242_v34 }
 0x145   : > { %v331_v41 = vpop.f32.mrf.mxu0  ;;  %v371_v42 = vpop.f32.mrf.mxu1 }
 0x146   : > { %427 = vst [vmem:[#allocation2] sm:$0xff] %v411_v39  ;;  %435 = vst [vmem:[#allocation2 + $0x20] sm:$0xff] %v419_v40  ;;  %v410_v45 = vadd.f32 %v331_v41, %v233_v37  ;;  %v418_v46 = vadd.f32 %v371_v42, %v241_v38 }
 0x147   : > { %v682_v47 = vpop.f32.mrf.mxu0  ;;  %v694_v48 = vpop.f32.mrf.mxu1 }
 0x148   : > { %426 = vst [vmem:[#allocation2 + $0x30] sm:$0xff] %v410_v45  ;;  %434 = vst [vmem:[#allocation2 + $0x40] sm:$0xff] %v418_v46  ;;  %v413_v51 = vadd.f32 %v682_v47, %v236_v43  ;;  %v421_v52 = vadd.f32 %v694_v48, %v244_v44 }
 0x149   : > { %v341_v53 = vpop.f32.mrf.mxu0  ;;  %v381_v54 = vpop.f32.mrf.mxu1 }
 0x14a   : > { %429 = vst [vmem:[#allocation2 + $0x18] sm:$0xff] %v413_v51  ;;  %437 = vst [vmem:[#allocation2 + $0x38] sm:$0xff] %v421_v52  ;;  %v412_v57 = vadd.f32 %v341_v53, %v235_v49  ;;  %v420_v58 = vadd.f32 %v381_v54, %v243_v50 }
 0x14b   : > { %v685_v59 = vpop.f32.mrf.mxu0  ;;  %v697_v60 = vpop.f32.mrf.mxu1 }
 0x14c   : > { %428 = vst [vmem:[#allocation2 + $0x58] sm:$0xff] %v412_v57  ;;  %436 = vst [vmem:[#allocation2 + $0x10] sm:$0xff] %v420_v58  ;;  %v415_v63 = vadd.f32 %v685_v59, %v238_v55  ;;  %v423_v0 = vadd.f32 %v697_v60, %v246_v56 }
 0x14d   : > { %v351_v1 = vpop.f32.mrf.mxu0  ;;  %v391_v2 = vpop.f32.mrf.mxu1 }
 0x14e   : > { %431 = vst [vmem:[#allocation2 + $0x68] sm:$0xff] %v415_v63  ;;  %439 = vst [vmem:[#allocation2 + $0x70] sm:$0xff] %v423_v0  ;;  %v414_v5 = vadd.f32 %v351_v1, %v237_v61  ;;  %v422_v6 = vadd.f32 %v391_v2, %v245_v62 }
 0x14f   : > { %v688_v7 = vpop.f32.mrf.mxu0  ;;  %v700_v8 = vpop.f32.mrf.mxu1 }
 0x150   : > { %430 = vst [vmem:[#allocation2 + $0x50] sm:$0xff] %v414_v5  ;;  %438 = vst [vmem:[#allocation2 + $0x60] sm:$0xff] %v422_v6  ;;  %v417_v11 = vadd.f32 %v688_v7, %v240_v3  ;;  %v425_v12 = vadd.f32 %v700_v8, %v248_v4  ;;  %445 = sbr.rel (%p605_p3) target bundleno = 350 (0x15e), region = 44 }
 0x151   : > { %v361_v13 = vpop.f32.mrf.mxu0  ;;  %v401_v14 = vpop.f32.mrf.mxu1 }
 0x152   : > { %433 = vst [vmem:[#allocation2 + $0x48] sm:$0xff] %v417_v11  ;;  %441 = vst [vmem:[#allocation2 + $0x28] sm:$0xff] %v425_v12  ;;  %v416_v15 = vadd.f32 %v361_v13, %v239_v9  ;;  %v424_v16 = vadd.f32 %v401_v14, %v247_v10 }
 0x154   : > { %432 = vst [vmem:[#allocation2 + $0x8] sm:$0xff] %v416_v15  ;;  %440 = vst [vmem:[#allocation2 + $0x78] sm:$0xff] %v424_v16 }
 0x155   : > { %v446_v17 = vld [vmem:[#allocation2 + $0x30] sm:$0xff]  ;;  %v447_v18 = vld [vmem:[#allocation2] sm:$0xff]  ;;  %v448_v19 = vld [vmem:[#allocation2 + $0x58] sm:$0xff] }
 0x156   : > { %462 = vst [vmem:[%s1223_s5] sm:$0xff] %v446_v17  ;;  %463 = vst [vmem:[%s1223_s5 + $0x8] sm:$0xff] %v447_v18  ;;  %v449_v20 = vld [vmem:[#allocation2 + $0x18] sm:$0xff]  ;;  %v451_v22 = vld [vmem:[#allocation2 + $0x68] sm:$0xff] }
 0x157   : > { %464 = vst [vmem:[%s1223_s5 + $0x10] sm:$0xff] %v448_v19  ;;  %v450_v21 = vld [vmem:[#allocation2 + $0x50] sm:$0xff]  ;;  %465 = vst [vmem:[%s1223_s5 + $0x18] sm:$0xff] %v449_v20  ;;  %v454_v25 = vld [vmem:[#allocation2 + $0x40] sm:$0xff] }
 0x158   : > { %466 = vst [vmem:[%s1223_s5 + $0x20] sm:$0xff] %v450_v21  ;;  %467 = vst [vmem:[%s1223_s5 + $0x28] sm:$0xff] %v451_v22  ;;  %v455_v26 = vld [vmem:[#allocation2 + $0x20] sm:$0xff]  ;;  %v456_v27 = vld [vmem:[#allocation2 + $0x10] sm:$0xff] }
 0x159   : > { %v453_v24 = vld [vmem:[#allocation2 + $0x48] sm:$0xff]  ;;  %470 = vst [vmem:[%s1223_s5 + $0x40] sm:$0xff] %v454_v25  ;;  %v457_v28 = vld [vmem:[#allocation2 + $0x38] sm:$0xff]  ;;  %471 = vst [vmem:[%s1223_s5 + $0x48] sm:$0xff] %v455_v26 }
 0x15a   : > { %469 = vst [vmem:[%s1223_s5 + $0x38] sm:$0xff] %v453_v24  ;;  %472 = vst [vmem:[%s1223_s5 + $0x50] sm:$0xff] %v456_v27  ;;  %v458_v29 = vld [vmem:[#allocation2 + $0x60] sm:$0xff]  ;;  %v459_v30 = vld [vmem:[#allocation2 + $0x70] sm:$0xff] }
 0x15b   : > { %v452_v23 = vld [vmem:[#allocation2 + $0x8] sm:$0xff]  ;;  %473 = vst [vmem:[%s1223_s5 + $0x58] sm:$0xff] %v457_v28  ;;  %v460_v31 = vld [vmem:[#allocation2 + $0x78] sm:$0xff]  ;;  %474 = vst [vmem:[%s1223_s5 + $0x60] sm:$0xff] %v458_v29 }
 0x15c   : > { %468 = vst [vmem:[%s1223_s5 + $0x30] sm:$0xff] %v452_v23  ;;  %475 = vst [vmem:[%s1223_s5 + $0x68] sm:$0xff] %v459_v30  ;;  %v461_v32 = vld [vmem:[#allocation2 + $0x28] sm:$0xff] }
 0x15d   : > { %476 = vst [vmem:[%s1223_s5 + $0x70] sm:$0xff] %v460_v31  ;;  %477 = vst [vmem:[%s1223_s5 + $0x78] sm:$0xff] %v461_v32 }
 0x15e PF: > { %s612_s15 = sshll.u32 %s1018_s16, 11  ;;  %s1386_s20 = sld [smem:[#allocation18_spill]] }
 0x15f   : > { %s492_s3 = sshll.u32 %s1223_s5, 4  ;;  %s1289_s12 = scalar_lea.sflag [#allocation5], %s190_s28  ;;  %s1285_s3 = int_to_ptr.vmem [resolvable:$true] %s492_s3 }
 0x160   : > { %s906_s1 = scalar_lea.vmem %s1285_s3, 2048  ;;  %p1387_p12 = scmp.ne.s32.totalorder %s1371_s27, 0 }
 0x161   : > { %p907_p10 = scmp.ne.s32.totalorder %s1285_s3, %s906_s1  ;;  %s1038_s16 = smov [#allocation8]  }
 0x162   : > { %s910_s9 = sshll.u32 %s1038_s16, 4  ;;  %s911_s9 = int_to_ptr.vmem [resolvable:$false] %s910_s9 }
 0x163   : > { %p908_p0 = pnand %p907_p10, %p1387_p12  ;;  %s912_s2 = scalar_lea.vmem %s911_s9, 4096 }
 0x164   : > { %s1282_s6 = scalar_lea.hbm %s1386_s20, %s612_s15  ;;  %p913_p2 = scmp.lt.s32.totalorder %s1285_s3, %s911_s9 }
 0x165   : > { %p909_p1 = pneg %p908_p0  ;;  %p914_p5 = scmp.lt.s32.totalorder %s912_s2, %s906_s1 }
 0x167   : > { %p915_p8 = por %p914_p5, %p913_p2 }
 0x169   : > { %p916_p9 = pnand %p915_p8, %p909_p1 }
 0x16b   : > { %919 = shalt.err (!%p916_p9)
}
 0x16c   : > { %s920_s24 = scalar_lea.hbm %s1282_s6, 2048  ;;  %s924_s21 = scalar_lea.hbm %s1386_s20, 6144 }
 0x16d   : > { %p921_p11 = scmp.ne.s32.totalorder %s1282_s6, %s920_s24  ;;  %p925_p6 = scmp.lt.s32.totalorder %s1282_s6, %s1386_s20 }
 0x16e   : > { %p926_p7 = scmp.lt.s32.totalorder %s924_s21, %s920_s24 }
 0x16f   : > { %p922_p13 = pnand %p921_p11, %p1387_p12 }
 0x170   : > { %p927_p3 = por %p926_p7, %p925_p6 }
 0x171   : > { %p923_p4 = pneg %p922_p13 }
 0x173   : > { %p928_p10 = pnand %p927_p3, %p923_p4 }
 0x175   : > { %931 = shalt.err (!%p928_p10)
}
 0x176   : > { %s1039_s29 = smov 128   ;;  %s1040_s5 = smov 8  }
 0x177   : > { %739 = dma.vmem_to_hbm [thread:$0]  (%p1387_p12), %s1285_s3, 2048, %s1282_s6, %s1289_s12, %s1039_s29, %s1039_s29, %s1040_s5  }
 0x178 PF: > { %s1388_s23 = sld [smem:[#allocation13_spill]] }
 0x179   : > { %s1389_s26 = sld [smem:[#allocation12_spill]] }
 0x17a   : > { %s1390_s15 = sld [smem:[#allocation14_spill]] }
 0x17e   : > { %p756_p0 = scmp.ge.s32.totalorder %s1388_s23, 2 }
 0x17f   : > { %s507_s25 = sand.u32 1, %s1389_s26  }
 0x180   : > { %p1391_p1 = scmp.ne.s32.totalorder %s1390_s15, 0  ;;  %s508_s4 = scalar_lea.sflag [#allocation5], %s507_s25 }
 0x182   : > { %p750_p2 = pnand %p756_p0, %p1391_p1 }
 0x184   : > { %p751_p5 = pneg %p750_p2 }
 0x186   : > { %985 = dma.done.wait (%p751_p5), %s508_s4, 2048  }
 0x187   : > { %987 = vsyncadd (%p751_p5), %s508_s4, 4294965248  ;;  %s19_s1 = sadd.s32 1, %s1388_s23   ;;  %s1392_s27 = sld [smem:[#allocation15_spill]] }
 0x188   : > { %p16_p8 = scmp.ge.s32.totalorder %s19_s1, 8   ;;  %s1393_s6 = sld [smem:[#allocation16_spill]] }
 0x189   : > { %s1394_s9 = smov %s994_s10  ;;  %s1395_s10 = smov %s998_s11 }
 0x18a   : > { %s1396_s11 = smov %s1194_s19  ;;  %s1397_s12 = smov %s1006_s13 }
 0x18b   : > { %s1398_s13 = smov %s1010_s14  ;;  %s1399_s14 = smov %s1199_s22 }
 0x18c   : > { %s1400_s15 = smov %s1022_s17  ;;  %s1401_s16 = smov %s1026_s18 }
 0x18d   : > { %s1402_s17 = smov %s1392_s27  ;;  %s1404_s19 = smov %s19_s1 }
 0x18e   : > { %s1403_s18 = smov %s1393_s6  ;;  %18 = sbr.rel (!%p16_p8) target bundleno = 13 (0xd), region = 86 }
 0x193   :  { %513 = vsyncpa [#allocation4], 1 }
 0x194   :  { %515 = vsyncpa [#allocation4 + $0x1], 1 }
 0x195   :  { %516 = vsyncpa [#allocation7], 1 }
 0x196   :  { %517 = vsyncpa [#allocation5], 1 }
 0x197   :  { %519 = vsyncpa [#allocation5 + $0x1], 1 }

</bundles_post_ra>
